<compile_context>
chip_gen: v5e
topology: v5e:2x2
jax: 0.10.0
libtpu: 0.0.40
codegen_flags: <defaults>
</compile_context>

<pallas_src>
import jax
import jax.numpy as jnp
from jax.experimental import pallas as pl
from jax.experimental.pallas import tpu as pltpu


def _round_up(n, m):
    return ((n + m - 1) // m) * m


def _pff_kernel(x_ref, w1a_ref, b1a_ref, w1b_ref, b1b_ref, w2t_ref, b2_ref, o_ref):
    """One (tm, idim_p) row tile of the position-wise feed forward.

    x_ref   : (tm, idim_p)
    w1a_ref : (idim_p, hid_p)   value half of w_1, pre-transposed
    b1a_ref : (1, hid_p)        value half of b_1 (f32)
    w1b_ref : (idim_p, hid_p)   gate  half of w_1, pre-transposed
    b1b_ref : (1, hid_p)        gate  half of b_1 (f32)
    w2t_ref : (hid_p, idim_p)   w_2, pre-transposed
    b2_ref  : (1, idim_p)       b_2 (f32)
    o_ref   : (tm, idim_p)
    """
    # Matmul operands in the weight dtype (f32 or bf16); accumulate in f32.
    x = x_ref[...].astype(w1a_ref.dtype)

    a = jnp.dot(x, w1a_ref[...], preferred_element_type=jnp.float32) + b1a_ref[...]
    b = jnp.dot(x, w1b_ref[...], preferred_element_type=jnp.float32) + b1b_ref[...]

    # GLU in f32: elementwise on the VPU, sigmoid on the EUP (v5e-safe).
    g = a * jax.nn.sigmoid(b)

    # Second linear; deliberate cast of g to the weight dtype for the MXU.
    out = jnp.dot(g.astype(w2t_ref.dtype), w2t_ref[...],
                  preferred_element_type=jnp.float32)
    o_ref[...] = (out + b2_ref[...]).astype(o_ref.dtype)


def positionwise_feed_forward(x, w1, b1, w2, b2, *, tm=256, param_dtype=None,
                              vmem_limit_bytes=64 * 1024 * 1024):
    """PositionwiseFeedForward forward pass (dropout_rate = 0.0).

    x  : (B, T, idim)
    w1 : (2*hidden, idim)   (PyTorch Linear weight layout: (out, in))
    b1 : (2*hidden,)
    w2 : (idim, hidden)
    b2 : (idim,)
    param_dtype : optional dtype for the matmul operands (e.g. jnp.bfloat16);
                  accumulation / GLU math stay float32.
    """
    B, T, idim = x.shape
    two_h = w1.shape[0]
    hid = two_h // 2
    assert w2.shape == (idim, hid)

    M = B * T
    # Lane-dense padding of feature dims; rows padded to a multiple of tm.
    idim_p = _round_up(idim, 128)
    hid_p = _round_up(hid, 128)
    tm = _round_up(min(tm, _round_up(M, 8)), 8)   # clamp tm for tiny inputs
    M_p = _round_up(M, tm)
    grid_m = pl.cdiv(M_p, tm)

    w_dtype = x.dtype if param_dtype is None else param_dtype

    # Flatten rows; zero-pad rows + feature dim (sliced off afterwards; the
    # zero-padded weight rows/cols keep padded lanes exactly zero).
    x2 = jnp.pad(x.reshape(M, idim), ((0, M_p - M), (0, idim_p - idim)))

    # Split w_1 / b_1 into GLU value (a) and gate (b) halves and pre-transpose
    # so the kernel runs row-major (tm, idim) @ (idim, H) MXU matmuls.
    w1a_t = jnp.pad(w1[:hid, :].T,
                    ((0, idim_p - idim), (0, hid_p - hid))).astype(w_dtype)
    w1b_t = jnp.pad(w1[hid:, :].T,
                    ((0, idim_p - idim), (0, hid_p - hid))).astype(w_dtype)
    b1a = jnp.pad(b1[:hid], (0, hid_p - hid)).reshape(1, hid_p).astype(jnp.float32)
    b1b = jnp.pad(b1[hid:], (0, hid_p - hid)).reshape(1, hid_p).astype(jnp.float32)
    w2_t = jnp.pad(w2.T,
                   ((0, hid_p - hid), (0, idim_p - idim))).astype(w_dtype)
    b2_2d = jnp.pad(b2, (0, idim_p - idim)).reshape(1, idim_p).astype(jnp.float32)

    # Grid-invariant operands: constant block index -> DMA'd once by the pipeline.
    const = lambda i: (0, 0)

    out = pl.pallas_call(
        _pff_kernel,
        out_shape=jax.ShapeDtypeStruct((M_p, idim_p), x.dtype),
        grid_spec=pltpu.PrefetchScalarGridSpec(
            num_scalar_prefetch=0,
            grid=(grid_m,),
            in_specs=[
                pl.BlockSpec((tm, idim_p), lambda i: (i, 0)),     # x rows
                pl.BlockSpec((idim_p, hid_p), const),             # w1 value half
                pl.BlockSpec((1, hid_p), const),                  # b1 value half
                pl.BlockSpec((idim_p, hid_p), const),             # w1 gate half
                pl.BlockSpec((1, hid_p), const),                  # b1 gate half
                pl.BlockSpec((hid_p, idim_p), const),             # w2
                pl.BlockSpec((1, idim_p), const),                 # b2
            ],
            out_specs=pl.BlockSpec((tm, idim_p), lambda i: (i, 0)),
        ),
        compiler_params=pltpu.CompilerParams(
            dimension_semantics=("parallel",),
            vmem_limit_bytes=vmem_limit_bytes,
        ),
    )(x2, w1a_t, b1a, w1b_t, b1b, w2_t, b2_2d)

    return out[:M, :idim].reshape(B, T, idim)


def _reference(x, w1, b1, w2, b2):
    h = jnp.einsum("btd,hd->bth", x, w1) + b1
    hid = w1.shape[0] // 2
    a, b = h[..., :hid], h[..., hid:]
    g = a * jax.nn.sigmoid(b)
    return jnp.einsum("bth,dh->btd", g, w2) + b2


if __name__ == "__main__":
    B, T, idim, hidden = 2, 8, 32, 32

    key = jax.random.PRNGKey(0)
    kx, k1, k2, k3, k4 = jax.random.split(key, 5)

    x = jax.random.normal(kx, (B, T, idim), dtype=jnp.float32)
    # PyTorch Linear shapes: (out, in) weights.
    w1 = jax.random.normal(k1, (2 * hidden, idim), dtype=jnp.float32) * 0.1
    b1 = jax.random.normal(k2, (2 * hidden,), dtype=jnp.float32) * 0.1
    w2 = jax.random.normal(k3, (idim, hidden), dtype=jnp.float32) * 0.1
    b2 = jax.random.normal(k4, (idim,), dtype=jnp.float32) * 0.1

    ref = _reference(x, w1, b1, w2, b2)

    # f32 path: exact check against the reference.
    out = jax.block_until_ready(positionwise_feed_forward(x, w1, b1, w2, b2))
    assert out.shape == (B, T, idim)
    assert jnp.allclose(out, ref, atol=1e-5, rtol=1e-5), "f32 mismatch vs reference"

    # bf16-weight path (MXU bf16 inputs, f32 accumulate): loose check.
    out_bf16 = jax.block_until_ready(
        positionwise_feed_forward(x, w1, b1, w2, b2, param_dtype=jnp.bfloat16))
    assert out_bf16.shape == (B, T, idim)
    assert bool(jnp.all(jnp.isfinite(out_bf16)))
    assert jnp.allclose(out_bf16, ref, atol=1e-1, rtol=1e-1), "bf16 mismatch vs reference"

    # TODO(synk): dropout_rate > 0.0 (training-mode dropout masking) not implemented;
    # module default is 0.0 so forward semantics are identity.

    print("KERNEL_OK")
</pallas_src>

<mosaic_0001>
module attributes {stable_mosaic.version = 11 : i64} {
  func.func @_pff_kernel(%arg0: i32, %arg1: memref<16x128xf32, #tpu.memory_space<vmem>>, %arg2: memref<128x128xf32, #tpu.memory_space<vmem>>, %arg3: memref<1x128xf32, #tpu.memory_space<vmem>>, %arg4: memref<128x128xf32, #tpu.memory_space<vmem>>, %arg5: memref<1x128xf32, #tpu.memory_space<vmem>>, %arg6: memref<128x128xf32, #tpu.memory_space<vmem>>, %arg7: memref<1x128xf32, #tpu.memory_space<vmem>>, %arg8: memref<16x128xf32, #tpu.memory_space<vmem>>) attributes {dimension_semantics = [#tpu.dimension_semantics<parallel>], iteration_bounds = array<i64: 1>, scalar_prefetch = 0 : i64, scratch_operands = 0 : i64, tpu.core_type = #tpu.core_type<tc>, window_params = [{transform_indices = @transform_0, window_bounds = array<i64: 16, 128>}, {pipeline_mode = #tpu.pipeline_mode<synchronous>, transform_indices = @transform_1, window_bounds = array<i64: 128, 128>}, {pipeline_mode = #tpu.pipeline_mode<synchronous>, transform_indices = @transform_2, window_bounds = array<i64: 1, 128>}, {pipeline_mode = #tpu.pipeline_mode<synchronous>, transform_indices = @transform_3, window_bounds = array<i64: 128, 128>}, {pipeline_mode = #tpu.pipeline_mode<synchronous>, transform_indices = @transform_4, window_bounds = array<i64: 1, 128>}, {pipeline_mode = #tpu.pipeline_mode<synchronous>, transform_indices = @transform_5, window_bounds = array<i64: 128, 128>}, {pipeline_mode = #tpu.pipeline_mode<synchronous>, transform_indices = @transform_6, window_bounds = array<i64: 1, 128>}, {transform_indices = @transform_7, window_bounds = array<i64: 16, 128>}]} {
    %c0 = arith.constant 0 : index
    %c0_0 = arith.constant 0 : index
    %0 = vector.load %arg1[%c0, %c0_0] : memref<16x128xf32, #tpu.memory_space<vmem>>, vector<16x128xf32>
    %c0_1 = arith.constant 0 : index
    %c0_2 = arith.constant 0 : index
    %1 = vector.load %arg2[%c0_1, %c0_2] : memref<128x128xf32, #tpu.memory_space<vmem>>, vector<128x128xf32>
    %cst = arith.constant dense<0.000000e+00> : vector<16x128xf32>
    %2 = tpu.matmul %0, %1, %cst {dimension_numbers = #tpu.dot_dimension_numbers<[1], [0], [0], [1], [0, 0, 1, 1], [], []>} : vector<16x128xf32>, vector<128x128xf32>, vector<16x128xf32> -> vector<16x128xf32>
    %c0_3 = arith.constant 0 : index
    %c0_4 = arith.constant 0 : index
    %3 = vector.load %arg3[%c0_3, %c0_4] : memref<1x128xf32, #tpu.memory_space<vmem>>, vector<1x128xf32>
    %4 = vector.broadcast %3 : vector<1x128xf32> to vector<16x128xf32>
    %5 = arith.addf %2, %4 : vector<16x128xf32>
    %c0_5 = arith.constant 0 : index
    %c0_6 = arith.constant 0 : index
    %6 = vector.load %arg4[%c0_5, %c0_6] : memref<128x128xf32, #tpu.memory_space<vmem>>, vector<128x128xf32>
    %cst_7 = arith.constant dense<0.000000e+00> : vector<16x128xf32>
    %7 = tpu.matmul %0, %6, %cst_7 {dimension_numbers = #tpu.dot_dimension_numbers<[1], [0], [0], [1], [0, 0, 1, 1], [], []>} : vector<16x128xf32>, vector<128x128xf32>, vector<16x128xf32> -> vector<16x128xf32>
    %c0_8 = arith.constant 0 : index
    %c0_9 = arith.constant 0 : index
    %8 = vector.load %arg5[%c0_8, %c0_9] : memref<1x128xf32, #tpu.memory_space<vmem>>, vector<1x128xf32>
    %9 = vector.broadcast %8 : vector<1x128xf32> to vector<16x128xf32>
    %10 = arith.addf %7, %9 : vector<16x128xf32>
    %11 = arith.negf %10 : vector<16x128xf32>
    %12 = math.exp %11 : vector<16x128xf32>
    %cst_10 = arith.constant 1.000000e+00 : f32
    %13 = vector.broadcast %cst_10 : f32 to vector<16x128xf32>
    %14 = arith.addf %13, %12 : vector<16x128xf32>
    %15 = arith.divf %13, %14 : vector<16x128xf32>
    %16 = arith.mulf %5, %15 : vector<16x128xf32>
    %c0_11 = arith.constant 0 : index
    %c0_12 = arith.constant 0 : index
    %17 = vector.load %arg6[%c0_11, %c0_12] : memref<128x128xf32, #tpu.memory_space<vmem>>, vector<128x128xf32>
    %cst_13 = arith.constant dense<0.000000e+00> : vector<16x128xf32>
    %18 = tpu.matmul %16, %17, %cst_13 {dimension_numbers = #tpu.dot_dimension_numbers<[1], [0], [0], [1], [0, 0, 1, 1], [], []>} : vector<16x128xf32>, vector<128x128xf32>, vector<16x128xf32> -> vector<16x128xf32>
    %c0_14 = arith.constant 0 : index
    %c0_15 = arith.constant 0 : index
    %19 = vector.load %arg7[%c0_14, %c0_15] : memref<1x128xf32, #tpu.memory_space<vmem>>, vector<1x128xf32>
    %20 = vector.broadcast %19 : vector<1x128xf32> to vector<16x128xf32>
    %21 = arith.addf %18, %20 : vector<16x128xf32>
    %c0_16 = arith.constant 0 : index
    %c0_17 = arith.constant 0 : index
    %22 = vector.load %arg8[%c0_16, %c0_17] : memref<16x128xf32, #tpu.memory_space<vmem>>, vector<16x128xf32>
    tpu.vector_store %arg8[%c0_16, %c0_17], %21 {strides = array<i32>} : memref<16x128xf32, #tpu.memory_space<vmem>>, vector<16x128xf32>,
    return
  }
  func.func @transform_0(%arg0: i32) -> (i32, i32) {
    %c0_i32 = arith.constant 0 : i32
    %c0_i32_0 = arith.constant 0 : i32
    return %arg0, %c0_i32 : i32, i32
  }
  func.func @transform_1(%arg0: i32) -> (i32, i32) {
    %c0_i32 = arith.constant 0 : i32
    %c0_i32_0 = arith.constant 0 : i32
    %c0_i32_1 = arith.constant 0 : i32
    return %c0_i32, %c0_i32_0 : i32, i32
  }
  func.func @transform_2(%arg0: i32) -> (i32, i32) {
    %c0_i32 = arith.constant 0 : i32
    %c0_i32_0 = arith.constant 0 : i32
    %c0_i32_1 = arith.constant 0 : i32
    return %c0_i32, %c0_i32_0 : i32, i32
  }
  func.func @transform_3(%arg0: i32) -> (i32, i32) {
    %c0_i32 = arith.constant 0 : i32
    %c0_i32_0 = arith.constant 0 : i32
    %c0_i32_1 = arith.constant 0 : i32
    return %c0_i32, %c0_i32_0 : i32, i32
  }
  func.func @transform_4(%arg0: i32) -> (i32, i32) {
    %c0_i32 = arith.constant 0 : i32
    %c0_i32_0 = arith.constant 0 : i32
    %c0_i32_1 = arith.constant 0 : i32
    return %c0_i32, %c0_i32_0 : i32, i32
  }
  func.func @transform_5(%arg0: i32) -> (i32, i32) {
    %c0_i32 = arith.constant 0 : i32
    %c0_i32_0 = arith.constant 0 : i32
    %c0_i32_1 = arith.constant 0 : i32
    return %c0_i32, %c0_i32_0 : i32, i32
  }
  func.func @transform_6(%arg0: i32) -> (i32, i32) {
    %c0_i32 = arith.constant 0 : i32
    %c0_i32_0 = arith.constant 0 : i32
    %c0_i32_1 = arith.constant 0 : i32
    return %c0_i32, %c0_i32_0 : i32, i32
  }
  func.func @transform_7(%arg0: i32) -> (i32, i32) {
    %c0_i32 = arith.constant 0 : i32
    %c0_i32_0 = arith.constant 0 : i32
    return %arg0, %c0_i32 : i32, i32
  }
}

</mosaic_0001>

<bundles_post_ra>
// kernel: tpu_custom_call.1
= control target key start
LH: loop header
LB: loop body
LE: loop exit
PB: predicated region body
PF: predicated region fallthrough
CT: control target
= control target key end

     0   :  { %12 = vsyncpa [#allocation3], 0  ;;  %s534_s0 = inlined_call_operand.hbm [shape: f32[16,128], index: 0, kind: input, shape index: {}]   ;;  %s535_s1 = inlined_call_operand.hbm [shape: f32[128,128], index: 1, kind: input, shape index: {}]   ;;  %s536_s2 = inlined_call_operand.vmem [shape: f32[1,128], index: 2, kind: input, shape index: {}]   ;;  %s537_s3 = inlined_call_operand.hbm [shape: f32[128,128], index: 3, kind: input, shape index: {}]   ;;  %s538_s4 = inlined_call_operand.vmem [shape: f32[1,128], index: 4, kind: input, shape index: {}]   ;;  %s539_s5 = inlined_call_operand.hbm [shape: f32[128,128], index: 5, kind: input, shape index: {}]   ;;  %s540_s6 = inlined_call_operand.vmem [shape: f32[1,128], index: 6, kind: input, shape index: {}]   ;;  %s541_s7 = inlined_call_operand.hbm [shape: f32[16,128], index: 7, kind: output, shape index: {}]  }
   0x1   :  { %13 = vsyncpa [#allocation6], 0 }
   0x2   :  { %14 = vsyncpa [#allocation9], 0 }
   0x3   :  { %15 = vsyncpa [#allocation4], 0  ;;  %s33_s26 = sshll.u32 %s535_s1, 4  ;;  %s448_s27 = smov [#allocation5]   ;;  %s34_s26 = int_to_ptr.hbm [resolvable:$true] %s33_s26 }
   0x4   :  { %s35_s28 = sshll.u32 %s448_s27, 4  ;;  %s20_s8 = sshll.u32 %s534_s0, 4  ;;  %s36_s28 = int_to_ptr.vmem [resolvable:$true] %s35_s28  ;;  %s21_s8 = int_to_ptr.hbm [resolvable:$true] %s20_s8 }
   0x5   :  { %s449_s9 = smov 128   ;;  %s450_s10 = smov 8  }
   0x6   :  { %41 = dma.hbm_to_vmem [thread:$0]  %s34_s26, 2048, %s36_s28, [#allocation6], %s449_s9, %s449_s9, %s450_s10  }
   0x7   :  { %s451_s11 = smov [#allocation2]   ;;  %s48_s1 = sshll.u32 %s537_s3, 4  ;;  %s49_s1 = int_to_ptr.hbm [resolvable:$true] %s48_s1 }
   0x8   :  { %s22_s12 = sshll.u32 %s451_s11, 4  ;;  %s63_s16 = sshll.u32 %s539_s5, 4  ;;  %s23_s12 = int_to_ptr.vmem [resolvable:$true] %s22_s12  ;;  %s64_s16 = int_to_ptr.hbm [resolvable:$true] %s63_s16 }
   0x9   :  { %28 = dma.hbm_to_vmem [thread:$0]  %s21_s8, 256, %s23_s12, [#allocation3], %s449_s9, %s449_s9, %s450_s10  }
   0xa   :  { %s452_s17 = smov [#allocation7]   ;;  %s453_s19 = smov [#allocation8]  }
   0xb   :  { %s50_s18 = sshll.u32 %s452_s17, 4  ;;  %s65_s3 = sshll.u32 %s453_s19, 4  ;;  %s51_s18 = int_to_ptr.vmem [resolvable:$true] %s50_s18  ;;  %s66_s3 = int_to_ptr.vmem [resolvable:$true] %s65_s3 }
   0xc   :  { %56 = dma.hbm_to_vmem [thread:$0]  %s49_s1, 2048, %s51_s18, [#allocation6], %s449_s9, %s449_s9, %s450_s10  }
   0xd   :  { %71 = dma.hbm_to_vmem [thread:$0]  %s64_s16, 2048, %s66_s3, [#allocation9], %s449_s9, %s449_s9, %s450_s10  }
   0xe   :  { %440 = dma.done.wait [#allocation3], 256  }
   0xf   :  { %441 = vsyncadd [#allocation3], 4294967040 }
  0x10   :  { %442 = dma.done.wait [#allocation6], 4096  }
  0x11   :  { %443 = vsyncadd [#allocation6], 4294963200 }
  0x12   :  { %444 = dma.done.wait [#allocation9], 2048  }
  0x13   :  { %445 = vsyncadd [#allocation9], 4294965248  ;;  %v150_v0 = vld [vmem:[#allocation7 + $0x78] sm:$0xff]  ;;  %v149_v1 = vld [vmem:[#allocation7 + $0x70] sm:$0xff]  ;;  %s454_s23 = smov [#allocation10]   ;;  %s269_s27 = sshll.u32 %s541_s7, 4  ;;  %s270_s27 = int_to_ptr.hbm [resolvable:$true] %s269_s27 }
  0x14   :  { %155 = vmatpush.msra.mxu1 %v150_v0  ;;  %v148_v2 = vld [vmem:[#allocation7 + $0x68] sm:$0xff]  ;;  %v147_v3 = vld [vmem:[#allocation7 + $0x60] sm:$0xff]  ;;  %v107_v4 = vld [vmem:[#allocation5 + $0x78] sm:$0xff]  ;;  %s267_s24 = sshll.u32 %s454_s23, 4  ;;  %s268_s24 = int_to_ptr.vmem [resolvable:$true] %s267_s24 }
  0x15   :  { %112 = vmatpush.msra.mxu0 %v107_v4  ;;  %v106_v5 = vld [vmem:[#allocation5 + $0x70] sm:$0xff]  ;;  %v146_v6 = vld [vmem:[#allocation7 + $0x58] sm:$0xff]  ;;  %286 = vmatpush.msra.mxu3 %v107_v4  ;;  %v105_v7 = vld [vmem:[#allocation5 + $0x68] sm:$0xff] }
  0x16   :  { %156 = vmatpush.msra.mxu1 %v149_v1  ;;  %v145_v8 = vld [vmem:[#allocation7 + $0x50] sm:$0xff]  ;;  %v104_v9 = vld [vmem:[#allocation5 + $0x60] sm:$0xff]  ;;  %v144_v10 = vld [vmem:[#allocation7 + $0x48] sm:$0xff] }
  0x17   :  { %113 = vmatpush.msra.mxu0 %v106_v5  ;;  %287 = vmatpush.msra.mxu3 %v106_v5  ;;  %v103_v11 = vld [vmem:[#allocation5 + $0x58] sm:$0xff]  ;;  %v143_v12 = vld [vmem:[#allocation7 + $0x40] sm:$0xff]  ;;  %v102_v13 = vld [vmem:[#allocation5 + $0x50] sm:$0xff] }
  0x18   :  { %157 = vmatpush.msra.mxu1 %v148_v2  ;;  %v142_v14 = vld [vmem:[#allocation7 + $0x38] sm:$0xff]  ;;  %v101_v15 = vld [vmem:[#allocation5 + $0x48] sm:$0xff]  ;;  %v141_v16 = vld [vmem:[#allocation7 + $0x30] sm:$0xff] }
  0x19   :  { %114 = vmatpush.msra.mxu0 %v105_v7  ;;  %288 = vmatpush.msra.mxu3 %v105_v7  ;;  %v100_v17 = vld [vmem:[#allocation5 + $0x40] sm:$0xff]  ;;  %v140_v18 = vld [vmem:[#allocation7 + $0x28] sm:$0xff]  ;;  %v99_v19 = vld [vmem:[#allocation5 + $0x38] sm:$0xff] }
  0x1a   :  { %158 = vmatpush.msra.mxu1 %v147_v3  ;;  %v139_v20 = vld [vmem:[#allocation7 + $0x20] sm:$0xff]  ;;  %v98_v21 = vld [vmem:[#allocation5 + $0x30] sm:$0xff]  ;;  %v138_v22 = vld [vmem:[#allocation7 + $0x18] sm:$0xff] }
  0x1b   :  { %115 = vmatpush.msra.mxu0 %v104_v9  ;;  %289 = vmatpush.msra.mxu3 %v104_v9  ;;  %v97_v23 = vld [vmem:[#allocation5 + $0x28] sm:$0xff]  ;;  %v137_v24 = vld [vmem:[#allocation7 + $0x10] sm:$0xff]  ;;  %v96_v25 = vld [vmem:[#allocation5 + $0x20] sm:$0xff] }
  0x1c   :  { %159 = vmatpush.msra.mxu1 %v146_v6  ;;  %v136_v26 = vld [vmem:[#allocation7 + $0x8] sm:$0xff]  ;;  %v95_v27 = vld [vmem:[#allocation5 + $0x18] sm:$0xff]  ;;  %v135_v28 = vld [vmem:[#allocation7] sm:$0xff] }
  0x1d   :  { %116 = vmatpush.msra.mxu0 %v103_v11  ;;  %290 = vmatpush.msra.mxu3 %v103_v11  ;;  %v94_v29 = vld [vmem:[#allocation5 + $0x10] sm:$0xff]  ;;  %v93_v31 = vld [vmem:[#allocation5 + $0x8] sm:$0xff]  ;;  %v92_v32 = vld [vmem:[#allocation5] sm:$0xff] }
  0x1e   :  { %160 = vmatpush.msra.mxu1 %v145_v8  ;;  %v90_v30 = vld [vmem:[#allocation2] sm:$0xff]  ;;  %v91_v33 = vld [vmem:[#allocation2 + $0x8] sm:$0xff]  ;;  %v231_v36 = vld [vmem:[#allocation8 + $0x68] sm:$0xff] }
  0x1f   :  { %117 = vmatpush.msra.mxu0 %v102_v13  ;;  %291 = vmatpush.msra.mxu3 %v102_v13  ;;  %v233_v34 = vld [vmem:[#allocation8 + $0x78] sm:$0xff]  ;;  %v232_v35 = vld [vmem:[#allocation8 + $0x70] sm:$0xff]  ;;  %v230_v37 = vld [vmem:[#allocation8 + $0x60] sm:$0xff] }
  0x20   :  { %161 = vmatpush.msra.mxu1 %v144_v10  ;;  %238 = vmatpush.msra.mxu2 %v233_v34  ;;  %v229_v38 = vld [vmem:[#allocation8 + $0x58] sm:$0xff]  ;;  %v228_v39 = vld [vmem:[#allocation8 + $0x50] sm:$0xff]  ;;  %v227_v40 = vld [vmem:[#allocation8 + $0x48] sm:$0xff] }
  0x21   :  { %118 = vmatpush.msra.mxu0 %v101_v15  ;;  %292 = vmatpush.msra.mxu3 %v101_v15  ;;  %v226_v41 = vld [vmem:[#allocation8 + $0x40] sm:$0xff]  ;;  %v225_v42 = vld [vmem:[#allocation8 + $0x38] sm:$0xff]  ;;  %v224_v43 = vld [vmem:[#allocation8 + $0x30] sm:$0xff] }
  0x22   :  { %162 = vmatpush.msra.mxu1 %v143_v12  ;;  %239 = vmatpush.msra.mxu2 %v232_v35  ;;  %v223_v44 = vld [vmem:[#allocation8 + $0x28] sm:$0xff]  ;;  %v222_v45 = vld [vmem:[#allocation8 + $0x20] sm:$0xff]  ;;  %v221_v46 = vld [vmem:[#allocation8 + $0x18] sm:$0xff] }
  0x23   :  { %119 = vmatpush.msra.mxu0 %v100_v17  ;;  %293 = vmatpush.msra.mxu3 %v100_v17  ;;  %v220_v47 = vld [vmem:[#allocation8 + $0x10] sm:$0xff]  ;;  %v219_v48 = vld [vmem:[#allocation8 + $0x8] sm:$0xff]  ;;  %v218_v50 = vld [vmem:[#allocation8] sm:$0xff] }
  0x24   :  { %163 = vmatpush.msra.mxu1 %v142_v14  ;;  %240 = vmatpush.msra.mxu2 %v231_v36  ;;  %v309_v49 = vld [vmem:[%s538_s4] ss:$0 sm:$0xff] }
  0x25   :  { %120 = vmatpush.msra.mxu0 %v99_v19  ;;  %294 = vmatpush.msra.mxu3 %v99_v19  ;;  %v310_v63 = vld [vmem:[%s536_s2] ss:$0 sm:$0xff] }
  0x26   :  { %164 = vmatpush.msra.mxu1 %v141_v16  ;;  %241 = vmatpush.msra.mxu2 %v230_v37 }
  0x27   :  { %121 = vmatpush.msra.mxu0 %v98_v21  ;;  %295 = vmatpush.msra.mxu3 %v98_v21 }
  0x28   :  { %165 = vmatpush.msra.mxu1 %v140_v18  ;;  %242 = vmatpush.msra.mxu2 %v229_v38 }
  0x29   :  { %122 = vmatpush.msra.mxu0 %v97_v23  ;;  %296 = vmatpush.msra.mxu3 %v97_v23 }
  0x2a   :  { %166 = vmatpush.msra.mxu1 %v139_v20  ;;  %243 = vmatpush.msra.mxu2 %v228_v39 }
  0x2b   :  { %123 = vmatpush.msra.mxu0 %v96_v25  ;;  %297 = vmatpush.msra.mxu3 %v96_v25 }
  0x2c   :  { %167 = vmatpush.msra.mxu1 %v138_v22  ;;  %244 = vmatpush.msra.mxu2 %v227_v40 }
  0x2d   :  { %124 = vmatpush.msra.mxu0 %v95_v27  ;;  %298 = vmatpush.msra.mxu3 %v95_v27 }
  0x2e   :  { %168 = vmatpush.msra.mxu1 %v137_v24  ;;  %245 = vmatpush.msra.mxu2 %v226_v41  ;;  %v311_v24 = vld [vmem:[%s540_s6] ss:$0 sm:$0xff] }
  0x2f   :  { %125 = vmatpush.msra.mxu0 %v94_v29  ;;  %299 = vmatpush.msra.mxu3 %v94_v29 }
  0x30   :  { %169 = vmatpush.msra.mxu1 %v136_v26  ;;  %246 = vmatpush.msra.mxu2 %v225_v42 }
  0x31   :  { %126 = vmatpush.msra.mxu0 %v93_v31  ;;  %300 = vmatpush.msra.mxu3 %v93_v31 }
  0x32   :  { %170 = vmatpush.msra.mxu1 %v135_v28  ;;  %247 = vmatpush.msra.mxu2 %v224_v43 }
  0x33   :  { %171 = vmatmul.f32.vlgmr.msra.gmra.mxu1 %v90_v30  ;;  %127 = vmatpush.msra.mxu0 %v92_v32 }
  0x34   :  { %128 = vmatmul.f32.vlgmr.msra.gmra.mxu0 %v90_v30  ;;  %301 = vmatpush.msra.mxu3 %v92_v32 }
  0x35   :  { %131 = vmatmul.f32.vlgmr.msra.gmra.mxu3 %v91_v33  ;;  %248 = vmatpush.msra.mxu2 %v223_v44 }
  0x37   :  { %249 = vmatpush.msra.mxu2 %v222_v45 }
  0x39   :  { %250 = vmatpush.msra.mxu2 %v221_v46 }
  0x3b   :  { %174 = vmatmul.f32.gmra.mxu1 %v91_v33  ;;  %251 = vmatpush.msra.mxu2 %v220_v47 }
  0x3d   :  { %252 = vmatpush.msra.mxu2 %v219_v48 }
  0x3f   :  { %253 = vmatpush.msra.mxu2 %v218_v50 }
  0xb0   :  { %v172_v51 = vpop.f32.mrf.mxu1 }
  0xb1   :  { %v173_v52 = vadd.f32 %v309_v49, %v172_v51  ;;  %v129_v1 = vpop.f32.mrf.mxu0 }
  0xb2   :  { %v130_v5 = vadd.f32 %v310_v63, %v129_v1 }
  0xb3   :  { %v284_v53 = vmul.f32 -1.442695, %v173_v52 }
  0xb5   :  { %312 = vpow2.f32 %v284_v53 }
  0xb8   :  { %v175_v54 = vpop.f32.mrf.mxu1  ;;  %v132_v14 = vpop.f32.mrf.mxu3 }
  0xb9   :  { %v176_v55 = vadd.f32 %v309_v49, %v175_v54  ;;  %v133_v18 = vadd.f32 %v310_v63, %v132_v14 }
  0xbb   :  { %v313_v56 = vpop.eup %312  ;;  %v285_v57 = vmul.f32 -1.442695, %v176_v55 }
  0xbc   :  { %v184_v58 = vadd.f32 1.0, %v313_v56 }
  0xbd   :  { %314 = vpow2.f32 %v285_v57 }
  0xbe   :  { %316 = vrcp.f32 %v184_v58  ;;  %v197_v2 = vand.u32 2147483648, %v184_v58  ;;  %v195_v4 = vand.u32 2147483647, %v184_v58  ;;  %vm191_vm1 = vweird.f32 %v184_v58 }
  0xc0   :  { %v198_v8 = vor.u32 1.1754944e-38, %v197_v2  ;;  %vm196_vm3 = vcmp.eq.f32.partialorder %v195_v4, 8.507059e+37 }
  0xc3   :  { %v315_v59 = vpop.eup %314 }
  0xc4   :  { %v317_v60 = vpop.eup %316  ;;  %v185_v61 = vadd.f32 1.0, %v315_v59 }
  0xc5   :  { %v187_v62 = vmul.f32 %v317_v60, %v184_v58  ;;  %vm192_vm0 = vweird.f32 %v317_v60 }
  0xc6   :  { %318 = vrcp.f32 %v185_v61  ;;  %vm193_vm2 = vmor %vm191_vm1, %vm192_vm0  ;;  %v212_v15 = vand.u32 2147483648, %v185_v61  ;;  %v210_v17 = vand.u32 2147483647, %v185_v61  ;;  %vm206_vm5 = vweird.f32 %v185_v61 }
  0xc7   :  { %v188_v0 = vsub.f32 1.0, %v187_v62 }
  0xc8   :  { %v213_v20 = vor.u32 1.1754944e-38, %v212_v15  ;;  %vm211_vm7 = vcmp.eq.f32.partialorder %v210_v17, 8.507059e+37 }
  0xc9   :  { %v189_v3 = vmul.f32 %v317_v60, %v188_v0 }
  0xcb   :  { %v190_v6 = vadd.f32 %v317_v60, %v189_v3 }
  0xcc   :  { %v319_v7 = vpop.eup %318 }
  0xcd   :  { %v194_v9 = vsel %vm193_vm2, %v317_v60, %v190_v6  ;;  %v202_v10 = vmul.f32 %v319_v7, %v185_v61  ;;  %vm207_vm4 = vweird.f32 %v319_v7 }
  0xce   :  { %v199_v11 = vsel %vm196_vm3, %v198_v8, %v194_v9  ;;  %vm208_vm6 = vmor %vm206_vm5, %vm207_vm4 }
  0xcf   :  { %v216_v12 = vmul.f32 %v199_v11, %v130_v5  ;;  %v203_v13 = vsub.f32 1.0, %v202_v10 }
  0xd1   :  { %254 = vmatmul.f32.vlgmr.msra.gmra.mxu2 %v216_v12  ;;  %v204_v16 = vmul.f32 %v319_v7, %v203_v13 }
  0xd3   :  { %v205_v19 = vadd.f32 %v319_v7, %v204_v16 }
  0xd5   :  { %v209_v21 = vsel %vm208_vm6, %v319_v7, %v205_v19 }
  0xd6   :  { %v214_v22 = vsel %vm211_vm7, %v213_v20, %v209_v21 }
  0xd7   :  { %v217_v23 = vmul.f32 %v214_v22, %v133_v18 }
  0xd9   :  { %257 = vmatmul.f32.gmra.mxu2 %v217_v23 }
 0x154   :  { %v255_v25 = vpop.f32.mrf.mxu2 }
 0x155   :  { %v256_v26 = vadd.f32 %v311_v24, %v255_v25 }
 0x157   :  { %261 = vst [vmem:[#allocation10] sm:$0xff] %v256_v26 }
 0x15c   :  { %v258_v27 = vpop.f32.mrf.mxu2 }
 0x15d   :  { %v259_v28 = vadd.f32 %v311_v24, %v258_v27 }
 0x15f   :  { %262 = vst [vmem:[#allocation10 + $0x8] sm:$0xff] %v259_v28 }
 0x160   :  { %275 = dma.vmem_to_hbm [thread:$0]  %s268_s24, 256, %s270_s27, [#allocation4], %s449_s9, %s449_s9, %s450_s10  }
 0x161   :  { %446 = dma.done.wait [#allocation4], 256  }
 0x162   :  { %447 = vsyncadd [#allocation4], 4294967040 }
 0x163   :  { %280 = vsyncpa [#allocation3], 1 }
 0x164   :  { %281 = vsyncpa [#allocation6], 1 }
 0x165   :  { %282 = vsyncpa [#allocation9], 1 }
 0x166   :  { %283 = vsyncpa [#allocation4], 1 }

</bundles_post_ra>
